<compile_context>
chip_gen: v6e
topology: v6e:2x2x1
jax: 0.10.0
libtpu: 0.0.40
codegen_flags: <defaults>
</compile_context>

<pallas_src>
import jax
import jax.numpy as jnp
from jax.experimental import pallas as pl
from jax.experimental.pallas import tpu as pltpu


def _mlp_kernel(x_ref, w1_ref, b1_ref, w2_ref, b2_ref, w3_ref, b3_ref, o_ref):
    xt = x_ref[...]                                              # (9, TILE_B)
    h1 = jnp.tanh(
        jnp.dot(w1_ref[...], xt, preferred_element_type=jnp.float32) + b1_ref[...]
    )                                                            # (20, TILE_B)
    h2 = jnp.tanh(
        jnp.dot(w2_ref[...], h1, preferred_element_type=jnp.float32) + b2_ref[...]
    )                                                            # (20, TILE_B)
    out = (
        jnp.dot(w3_ref[...], h2, preferred_element_type=jnp.float32) + b3_ref[...]
    )                                                            # (1, TILE_B)
    o_ref[...] = out.astype(o_ref.dtype)


def nn3_prior_forward(x, params, tile_b=None):
    """x: (B, 9) float32. params: dict with PyTorch-layout weights
    w1 (20,9), b1 (20,1), w2 (20,20), b2 (20,1), w3 (1,20), b3 (1,1)."""
    B, F = x.shape
    assert F == 9, x.shape

    if tile_b is None:
        # Large lane-dense tiles amortize per-step overhead; cap so padded
        # double-buffered tiles fit comfortably even in v7x's 64 MiB VMEM.
        tile_b = min(8192, pl.cdiv(max(B, 1), 128) * 128)
    b_pad = pl.cdiv(B, tile_b) * tile_b

    # Transpose to (9, B) so the batch rides the 128-wide lane axis, pad batch.
    xt = jnp.pad(x.T, ((0, 0), (0, b_pad - B)))

    const_spec = lambda shape: pl.BlockSpec(shape, lambda i: (0, 0))

    out_t = pl.pallas_call(
        _mlp_kernel,
        out_shape=jax.ShapeDtypeStruct((1, b_pad), jnp.float32),
        grid=(b_pad // tile_b,),
        in_specs=[
            pl.BlockSpec((9, tile_b), lambda i: (0, i)),   # x tile, pipelined
            const_spec(params["w1"].shape),                # weights resident
            const_spec(params["b1"].shape),
            const_spec(params["w2"].shape),
            const_spec(params["b2"].shape),
            const_spec(params["w3"].shape),
            const_spec(params["b3"].shape),
        ],
        out_specs=pl.BlockSpec((1, tile_b), lambda i: (0, i)),
        compiler_params=pltpu.CompilerParams(
            dimension_semantics=("parallel",),
        ),
    )(xt, params["w1"], params["b1"], params["w2"], params["b2"],
      params["w3"], params["b3"])

    return out_t[0, :B].reshape(B, 1)


def init_params(key):
    """PyTorch nn.Linear default init: U(-1/sqrt(fan_in), 1/sqrt(fan_in)).
    Weights stored PyTorch-style as (out_features, in_features); biases (out, 1)."""
    hidden = 20
    dims = [(9, hidden), (hidden, hidden), (hidden, 1)]   # (fan_in, fan_out)
    params = {}
    for i, (fin, fout) in enumerate(dims, start=1):
        key, kw, kb = jax.random.split(key, 3)
        bound = 1.0 / jnp.sqrt(jnp.float32(fin))
        params[f"w{i}"] = jax.random.uniform(
            kw, (fout, fin), jnp.float32, minval=-bound, maxval=bound
        )
        params[f"b{i}"] = jax.random.uniform(
            kb, (fout, 1), jnp.float32, minval=-bound, maxval=bound
        )
    return params


def reference_forward(x, params):
    """Plain-JAX reference matching PyTorch: y = x @ W.T + b per layer."""
    h1 = jnp.tanh(x @ params["w1"].T + params["b1"].T)
    h2 = jnp.tanh(h1 @ params["w2"].T + params["b2"].T)
    return h2 @ params["w3"].T + params["b3"].T


if __name__ == "__main__":
    key = jax.random.PRNGKey(0)
    kx, kx2, kp = jax.random.split(key, 3)
    params = init_params(kp)

    # Small batch (single tile).
    batch = 8
    x = jax.random.normal(kx, (batch, 9), jnp.float32)
    out = jax.block_until_ready(nn3_prior_forward(x, params))
    ref = reference_forward(x, params)
    assert out.shape == (batch, 1), out.shape
    assert jnp.allclose(out, ref, atol=1e-5, rtol=1e-5)

    # Batch not divisible by the tile -> exercises padding + multi-step grid.
    batch2 = 200
    x2 = jax.random.normal(kx2, (batch2, 9), jnp.float32)
    out2 = jax.block_until_ready(nn3_prior_forward(x2, params, tile_b=128))
    ref2 = reference_forward(x2, params)
    assert out2.shape == (batch2, 1), out2.shape
    assert jnp.allclose(out2, ref2, atol=1e-5, rtol=1e-5)

    print("KERNEL_OK")
</pallas_src>

<mosaic_0001>
module attributes {stable_mosaic.version = 11 : i64} {
  func.func @_mlp_kernel(%arg0: i32, %arg1: memref<9x128xf32, #tpu.memory_space<vmem>>, %arg2: memref<20x9xf32, #tpu.memory_space<vmem>>, %arg3: memref<20x1xf32, #tpu.memory_space<vmem>>, %arg4: memref<20x20xf32, #tpu.memory_space<vmem>>, %arg5: memref<20x1xf32, #tpu.memory_space<vmem>>, %arg6: memref<1x20xf32, #tpu.memory_space<vmem>>, %arg7: memref<1x1xf32, #tpu.memory_space<vmem>>, %arg8: memref<1x128xf32, #tpu.memory_space<vmem>>) attributes {dimension_semantics = [#tpu.dimension_semantics<parallel>], iteration_bounds = array<i64: 1>, scalar_prefetch = 0 : i64, scratch_operands = 0 : i64, tpu.core_type = #tpu.core_type<tc>, window_params = [{transform_indices = @transform_0, window_bounds = array<i64: 9, 128>}, {pipeline_mode = #tpu.pipeline_mode<synchronous>, transform_indices = @transform_1, window_bounds = array<i64: 20, 9>}, {pipeline_mode = #tpu.pipeline_mode<synchronous>, transform_indices = @transform_2, window_bounds = array<i64: 20, 1>}, {pipeline_mode = #tpu.pipeline_mode<synchronous>, transform_indices = @transform_3, window_bounds = array<i64: 20, 20>}, {pipeline_mode = #tpu.pipeline_mode<synchronous>, transform_indices = @transform_4, window_bounds = array<i64: 20, 1>}, {pipeline_mode = #tpu.pipeline_mode<synchronous>, transform_indices = @transform_5, window_bounds = array<i64: 1, 20>}, {pipeline_mode = #tpu.pipeline_mode<synchronous>, transform_indices = @transform_6, window_bounds = array<i64: 1, 1>}, {transform_indices = @transform_7, window_bounds = array<i64: 1, 128>}]} {
    %c0 = arith.constant 0 : index
    %c0_0 = arith.constant 0 : index
    %0 = vector.load %arg1[%c0, %c0_0] : memref<9x128xf32, #tpu.memory_space<vmem>>, vector<9x128xf32>
    %c0_1 = arith.constant 0 : index
    %c0_2 = arith.constant 0 : index
    %1 = vector.load %arg2[%c0_1, %c0_2] : memref<20x9xf32, #tpu.memory_space<vmem>>, vector<20x9xf32>
    %cst = arith.constant dense<0.000000e+00> : vector<20x128xf32>
    %2 = tpu.matmul %1, %0, %cst {dimension_numbers = #tpu.dot_dimension_numbers<[1], [0], [0], [1], [0, 0, 1, 1], [], []>} : vector<20x9xf32>, vector<9x128xf32>, vector<20x128xf32> -> vector<20x128xf32>
    %c0_3 = arith.constant 0 : index
    %c0_4 = arith.constant 0 : index
    %3 = vector.load %arg3[%c0_3, %c0_4] : memref<20x1xf32, #tpu.memory_space<vmem>>, vector<20x1xf32>
    %4 = vector.broadcast %3 : vector<20x1xf32> to vector<20x128xf32>
    %5 = arith.addf %2, %4 : vector<20x128xf32>
    %6 = math.tanh %5 : vector<20x128xf32>
    %c0_5 = arith.constant 0 : index
    %c0_6 = arith.constant 0 : index
    %7 = vector.load %arg4[%c0_5, %c0_6] : memref<20x20xf32, #tpu.memory_space<vmem>>, vector<20x20xf32>
    %cst_7 = arith.constant dense<0.000000e+00> : vector<20x128xf32>
    %8 = tpu.matmul %7, %6, %cst_7 {dimension_numbers = #tpu.dot_dimension_numbers<[1], [0], [0], [1], [0, 0, 1, 1], [], []>} : vector<20x20xf32>, vector<20x128xf32>, vector<20x128xf32> -> vector<20x128xf32>
    %c0_8 = arith.constant 0 : index
    %c0_9 = arith.constant 0 : index
    %9 = vector.load %arg5[%c0_8, %c0_9] : memref<20x1xf32, #tpu.memory_space<vmem>>, vector<20x1xf32>
    %10 = vector.broadcast %9 : vector<20x1xf32> to vector<20x128xf32>
    %11 = arith.addf %8, %10 : vector<20x128xf32>
    %12 = math.tanh %11 : vector<20x128xf32>
    %c0_10 = arith.constant 0 : index
    %c0_11 = arith.constant 0 : index
    %13 = vector.load %arg6[%c0_10, %c0_11] : memref<1x20xf32, #tpu.memory_space<vmem>>, vector<1x20xf32>
    %cst_12 = arith.constant dense<0.000000e+00> : vector<1x128xf32>
    %14 = tpu.matmul %13, %12, %cst_12 {dimension_numbers = #tpu.dot_dimension_numbers<[1], [0], [0], [1], [0, 0, 1, 1], [], []>} : vector<1x20xf32>, vector<20x128xf32>, vector<1x128xf32> -> vector<1x128xf32>
    %c0_13 = arith.constant 0 : index
    %c0_14 = arith.constant 0 : index
    %15 = vector.load %arg7[%c0_13, %c0_14] : memref<1x1xf32, #tpu.memory_space<vmem>>, vector<1x1xf32>
    %16 = vector.broadcast %15 : vector<1x1xf32> to vector<1x128xf32>
    %17 = arith.addf %14, %16 : vector<1x128xf32>
    %c0_15 = arith.constant 0 : index
    %c0_16 = arith.constant 0 : index
    %18 = vector.load %arg8[%c0_15, %c0_16] : memref<1x128xf32, #tpu.memory_space<vmem>>, vector<1x128xf32>
    tpu.vector_store %arg8[%c0_15, %c0_16], %17 {strides = array<i32>} : memref<1x128xf32, #tpu.memory_space<vmem>>, vector<1x128xf32>,
    return
  }
  func.func @transform_0(%arg0: i32) -> (i32, i32) {
    %c0_i32 = arith.constant 0 : i32
    %c0_i32_0 = arith.constant 0 : i32
    return %c0_i32, %arg0 : i32, i32
  }
  func.func @transform_1(%arg0: i32) -> (i32, i32) {
    %c0_i32 = arith.constant 0 : i32
    %c0_i32_0 = arith.constant 0 : i32
    %c0_i32_1 = arith.constant 0 : i32
    return %c0_i32, %c0_i32_0 : i32, i32
  }
  func.func @transform_2(%arg0: i32) -> (i32, i32) {
    %c0_i32 = arith.constant 0 : i32
    %c0_i32_0 = arith.constant 0 : i32
    %c0_i32_1 = arith.constant 0 : i32
    return %c0_i32, %c0_i32_0 : i32, i32
  }
  func.func @transform_3(%arg0: i32) -> (i32, i32) {
    %c0_i32 = arith.constant 0 : i32
    %c0_i32_0 = arith.constant 0 : i32
    %c0_i32_1 = arith.constant 0 : i32
    return %c0_i32, %c0_i32_0 : i32, i32
  }
  func.func @transform_4(%arg0: i32) -> (i32, i32) {
    %c0_i32 = arith.constant 0 : i32
    %c0_i32_0 = arith.constant 0 : i32
    %c0_i32_1 = arith.constant 0 : i32
    return %c0_i32, %c0_i32_0 : i32, i32
  }
  func.func @transform_5(%arg0: i32) -> (i32, i32) {
    %c0_i32 = arith.constant 0 : i32
    %c0_i32_0 = arith.constant 0 : i32
    %c0_i32_1 = arith.constant 0 : i32
    return %c0_i32, %c0_i32_0 : i32, i32
  }
  func.func @transform_6(%arg0: i32) -> (i32, i32) {
    %c0_i32 = arith.constant 0 : i32
    %c0_i32_0 = arith.constant 0 : i32
    %c0_i32_1 = arith.constant 0 : i32
    return %c0_i32, %c0_i32_0 : i32, i32
  }
  func.func @transform_7(%arg0: i32) -> (i32, i32) {
    %c0_i32 = arith.constant 0 : i32
    %c0_i32_0 = arith.constant 0 : i32
    return %c0_i32, %arg0 : i32, i32
  }
}

</mosaic_0001>

<bundles_post_ra>
// kernel: tpu_custom_call.1
= control target key start
LH: loop header
LB: loop body
LE: loop exit
PB: predicated region body
PF: predicated region fallthrough
CT: control target
= control target key end

     0   :  { %s597_s0 = inlined_call_operand.vmem [shape: f32[9,128], index: 0, kind: input, shape index: {}]   ;;  %s598_s1 = inlined_call_operand.vmem [shape: f32[20,9], index: 1, kind: input, shape index: {}]   ;;  %s599_s2 = inlined_call_operand.vmem [shape: f32[20,1], index: 2, kind: input, shape index: {}]   ;;  %s600_s3 = inlined_call_operand.vmem [shape: f32[20,20], index: 3, kind: input, shape index: {}]   ;;  %s601_s4 = inlined_call_operand.vmem [shape: f32[20,1], index: 4, kind: input, shape index: {}]   ;;  %s602_s5 = inlined_call_operand.vmem [shape: f32[1,20], index: 5, kind: input, shape index: {}]   ;;  %s603_s6 = inlined_call_operand.<no memory space> [shape: f32[1,1], index: 6, kind: input, shape index: {}]   ;;  %s604_s7 = inlined_call_operand.hbm [shape: f32[1,128], index: 7, kind: output, shape index: {}]  }
   0x1   :  { %v12_v0 = vstv %s603_s6 }
   0x2   :  { %13 = vst [vmem:[#allocation2] sm:$0x1] %v12_v0 }
   0x3   :  { %v30_v1 = vld [vmem:[%s597_s0 + $0x8] sm:$0x1]  ;;  %vm62_vm0 = vcmask 1040384   ;;  %v471_v2 = vmov 0.0   ;;  %v29_v3 = vld [vmem:[%s597_s0] sm:$0xff]  ;;  %vm472_vm1 = vmmov 0  }
   0x4   :  { %394 = vmatprep.subr.mxu0 %v471_v2  ;;  %398 = vmatprep.mubr.msk.f32.mxu0 %vm472_vm1, %v471_v2  ;;  %v31_v4 = vld [vmem:[%s598_s1] sm:$0xff]  ;;  %vm52_vm2 = vcmask 72704   ;;  %v473_v5 = vmov 0   ;;  %v36_v6 = vld [vmem:[%s599_s2 + $0x10] sm:$0xf]  ;;  %v35_v8 = vld [vmem:[%s599_s2 + $0x8] sm:$0xff] }
   0x5   :  { %395 = vmatpush3.msk.msra.mxu0 %vm62_vm0, %v30_v1  ;;  %435 = vset.pattern.permute.xlu0 %v473_v5  ;;  %v34_v7 = vld [vmem:[%s599_s2] sm:$0xff] }
   0x6   :  { %396 = vmatprep.subr.mxu0 %v471_v2  ;;  %49 = vperm.xlu0 %435, %v36_v6  }
   0x7   :  { %397 = vmatpush3.msra.mxu0 %v29_v3  ;;  %436 = vset.pattern.permute.xlu1 %v473_v5 }
   0x8   :  { %14 = vsyncpa [#allocation4], 0  ;;  %399 = vmatmul.mubr.msk.f32.vlgmr.msra.gmra.mxu0 %vm52_vm2, %v31_v4  ;;  %39 = vperm.xlu1 %436, %v34_v7   ;;  %v32_v9 = vld [vmem:[%s598_s1 + $0x8] sm:$0xff]  ;;  %v154_v10 = vld [vmem:[%s601_s4 + $0x10] sm:$0xf]  ;;  %vm180_vm3 = vcmask 1043456   ;;  %v274_v49 = vlaneseq }
   0x9   :  { %401 = vmatprep.mubr.msk.f32.mxu0 %vm472_vm1, %v471_v2  ;;  %407 = vmatprep.subr.mxu1 %v471_v2  ;;  %v153_v11 = vld [vmem:[%s601_s4 + $0x8] sm:$0xff]  ;;  %v33_v12 = vld [vmem:[%s598_s1 + $0x10] sm:$0xf]  ;;  %v152_v13 = vld [vmem:[%s601_s4] sm:$0xff]  ;;  %vm170_vm4 = vcmask 162816   ;;  %s474_s27 = smov [#allocation3]  }
   0xa   :  { %44 = vperm.xlu0 %435, %v35_v8   ;;  %413 = vmatprep.mubr.msk.f32.mxu1 %vm472_vm1, %v471_v2  ;;  %v268_v14 = vld [vmem:[#allocation2] sm:$0x1]  ;;  %v150_v31 = vld [vmem:[%s600_s3 + $0x8] sm:$0xff]  ;;  %v151_v32 = vld [vmem:[%s600_s3 + $0x10] sm:$0xf]  ;;  %v275_v50 = vshrl.u32 %v274_v49, 7 }
   0xb   :  { %422 = vmatprep.subr.mxu0 %v471_v2  ;;  %v149_v29 = vld [vmem:[%s600_s3] sm:$0xff]  ;;  %s361_s28 = sshll.u32 %s474_s27, 4  ;;  %s362_s28 = int_to_ptr.vmem [resolvable:$true] %s361_s28 }
   0xc   :  { %402 = vmatmul.mubr.msk.f32.gmra.mxu0 %vm52_vm2, %v32_v9  ;;  %167 = vperm.xlu1 %436, %v154_v10   ;;  %v267_v47 = vld [vmem:[%s602_s5] sm:$0x1]  ;;  %v276_v51 = vsub.s32 0, %v275_v50  ;;  %s449_s29 = scalar_lea.vmem %s362_s28, 16  ;;  %s453_s5 = scalar_lea.vmem %s362_s28, 32 }
   0xd   :  { %404 = vmatprep.mubr.msk.f32.mxu0 %vm472_vm1, %v471_v2  ;;  %p450_p0 = scmp.ne.s32.totalorder %s362_s28, %s449_s29  ;;  %p454_p1 = scmp.lt.s32.totalorder %s362_s28, %s362_s28 }
   0xe   :  { %162 = vperm.xlu0 %435, %v153_v11   ;;  %p455_p2 = scmp.lt.s32.totalorder %s453_s5, %s449_s29 }
  0x10   :  { %405 = vmatmul.mubr.msk.f32.gmra.mxu0 %vm52_vm2, %v33_v12  ;;  %157 = vperm.xlu1 %436, %v152_v13   ;;  %p456_p3 = por %p455_p2, %p454_p1 }
  0x11   :  { %428 = vmatprep.mubr.msk.f32.mxu0 %vm472_vm1, %v471_v2 }
  0x12   :  { %271 = vperm.xlu0 %435, %v268_v14   ;;  %p457_p4 = pnand %p456_p3, %p450_p0 }
  0x81   :  { %v50_v16 = vpop.permute.xlu0 %49 }
  0x83   :  { %v40_v20 = vpop.permute.xlu1 %39 }
  0x85   :  { %v45_v21 = vpop.permute.xlu0 %44 }
  0x87   :  { %v168_v35 = vpop.permute.xlu1 %167 }
  0x89   :  { %v163_v38 = vpop.permute.xlu0 %162 }
  0x8b   :  { %v158_v42 = vpop.permute.xlu1 %157 }
  0x8d   :  { %v272_v52 = vpop.permute.xlu0 %271 }
  0x8e   :  { %v277_v53 = vrot.slane %v272_v52, %v276_v51 }
  0xc8   :  { %v132_v15 = vpop.f32.mrf.mxu0 }
  0xc9   :  { %v133_v26 = vadd.f32 %v132_v15, %v40_v20 }
  0xca   :  { %v400_v17 = vpop.f32.mrf.mxu0 }
  0xcc   :  { %v137_v18 = vpop.f32.mrf.mxu0 }
  0xcd   :  { %v138_v23 = vadd.f32 %v137_v18, %v45_v21 }
  0xce   :  { %v403_v19 = vpop.f32.mrf.mxu0 }
  0xd0   :  { %v142_v22 = vpop.f32.mrf.mxu0 }
  0xd1   :  { %v143_v24 = vadd.f32 %v142_v22, %v50_v16 }
  0xd2   :  { %v406_v25 = vpop.f32.mrf.mxu0 }
  0xd3   :  { %437 = vtanh.f32 %v143_v24 }
  0xd4   :  { %439 = vtanh.f32 %v138_v23 }
  0xd5   :  { %441 = vtanh.f32 %v133_v26 }
  0xe0   :  { %v438_v27 = vpop.eup %437 }
  0xe1   :  { %408 = vmatpush3.msk.msra.mxu1 %vm180_vm3, %v438_v27  ;;  %v440_v28 = vpop.eup %439 }
  0xe2   :  { %409 = vmatprep.subr.mxu1 %v471_v2  ;;  %v442_v30 = vpop.eup %441 }
  0xe3   :  { %410 = vmatpush3.msra.mxu1 %v440_v28 }
  0xe4   :  { %411 = vmatprep.subr.mxu1 %v471_v2 }
  0xe5   :  { %412 = vmatpush3.msra.mxu1 %v442_v30 }
  0xe6   :  { %414 = vmatmul.mubr.msk.f32.vlgmr.msra.gmra.mxu1 %vm170_vm4, %v149_v29 }
  0xe7   :  { %416 = vmatprep.mubr.msk.f32.mxu1 %vm472_vm1, %v471_v2 }
  0xea   :  { %417 = vmatmul.mubr.msk.f32.gmra.mxu1 %vm170_vm4, %v150_v31 }
  0xeb   :  { %419 = vmatprep.mubr.msk.f32.mxu1 %vm472_vm1, %v471_v2 }
  0xee   :  { %420 = vmatmul.mubr.msk.f32.gmra.mxu1 %vm170_vm4, %v151_v32 }
 0x1a6   :  { %v250_v33 = vpop.f32.mrf.mxu1 }
 0x1a7   :  { %v251_v44 = vadd.f32 %v250_v33, %v158_v42 }
 0x1a8   :  { %v415_v34 = vpop.f32.mrf.mxu1 }
 0x1aa   :  { %v255_v36 = vpop.f32.mrf.mxu1 }
 0x1ab   :  { %v256_v40 = vadd.f32 %v255_v36, %v163_v38 }
 0x1ac   :  { %v418_v37 = vpop.f32.mrf.mxu1 }
 0x1ae   :  { %v260_v39 = vpop.f32.mrf.mxu1 }
 0x1af   :  { %v261_v41 = vadd.f32 %v260_v39, %v168_v35 }
 0x1b0   :  { %v421_v43 = vpop.f32.mrf.mxu1 }
 0x1b1   :  { %443 = vtanh.f32 %v261_v41 }
 0x1b2   :  { %445 = vtanh.f32 %v256_v40 }
 0x1b3   :  { %447 = vtanh.f32 %v251_v44 }
 0x1be   :  { %v444_v45 = vpop.eup %443 }
 0x1bf   :  { %423 = vmatpush3.msk.msra.mxu0 %vm180_vm3, %v444_v45  ;;  %v446_v46 = vpop.eup %445 }
 0x1c0   :  { %424 = vmatprep.subr.mxu0 %v471_v2  ;;  %v448_v48 = vpop.eup %447 }
 0x1c1   :  { %425 = vmatpush3.msra.mxu0 %v446_v46 }
 0x1c2   :  { %426 = vmatprep.subr.mxu0 %v471_v2 }
 0x1c3   :  { %427 = vmatpush3.msra.mxu0 %v448_v48 }
 0x1c4   :  { %429 = vmatmul.mubr.msk.f32.vlgmr.msra.gmra.mxu0 %vm170_vm4, %v267_v47 }
 0x284   :  { %v350_v54 = vpop.f32.mrf.mxu0 }
 0x285   :  { %v351_v55 = vadd.f32 %v350_v54, %v277_v53 }
 0x286   :  { %v430_v56 = vpop.f32.mrf.mxu0 }
 0x287   :  { %354 = vst [vmem:[#allocation3] sm:$0x1] %v351_v55 }
 0x288   :  { %460 = shalt.err (!%p457_p4)
}
 0x289   :  { %364 = dma.vmem_to_hbm [thread:$0]  %s362_s28, 16, %s604_s7, [#allocation4]  }
 0x28a   :  { %469 = dma.done.wait [#allocation4], 16  }
 0x28b   :  { %470 = vsyncadd [#allocation4], 4294967280 }
 0x28c   :  { %368 = vsyncpa [#allocation4], 1 }

</bundles_post_ra>
